<compile_context>
chip_gen: v7x
topology: tpu7x:2x2x1
jax: 0.10.0
libtpu: 0.0.40
codegen_flags: <defaults>
</compile_context>

<pallas_src>
import functools

import numpy as np
import jax
import jax.numpy as jnp
from jax.experimental import pallas as pl
from jax.experimental.pallas import tpu as pltpu

# Module hyper-parameters (from transformer.py)
BLOCK_SIZE = 2                 # max sequence length / causal mask size
N_EMBED = 132
HEAD_SIZE = N_EMBED // 3       # 44

_LANE = 128                    # lane width; each fused projection gets one slot
_SUBLANE = 8                   # rows are padded to a full sublane group


def _head_kernel(x_ref, w_ref, mask_ref, o_ref, *, pad):
    # x_ref   : (BT_pad, H)      bf16
    # w_ref   : (H, 3*pad)       bf16  (pad lanes exactly zero, scale folded in Q)
    # mask_ref: (BT_pad, BT_pad) f32   (additive 0 / -1e30 block-diag causal mask)
    # o_ref   : (BT_pad, pad)    f32   (lane-dense; pad lanes come out zero)
    x = x_ref[...]

    # Fused QKV projection: one bf16 MXU pass, f32 accumulation.  Each
    # projection occupies its own lane-aligned 128-wide slot, so the slices
    # below are free lane-aligned views and the zero pad lanes contribute
    # nothing to the contractions.
    qkv = jnp.dot(x, w_ref[...], preferred_element_type=jnp.float32)  # (BT, 3*pad) f32
    k = qkv[:, 0 * pad:1 * pad]          # (BT, pad)
    q = qkv[:, 1 * pad:2 * pad]          # (BT, pad)  (H**-0.5 already folded into W_q)
    v = qkv[:, 2 * pad:3 * pad]          # (BT, pad)

    # scores = q @ k^T without materializing a transpose: contract last dims.
    scores = jax.lax.dot_general(
        q, k, (((1,), (1,)), ((), ())), preferred_element_type=jnp.float32
    )  # (BT, BT) f32

    # Precomputed additive block-diagonal causal mask (0 allowed / -1e30 masked).
    scores = scores + mask_ref[...]

    # Numerically stable softmax, all in f32 (v5e-safe); exact EUP reciprocal.
    scores = scores - jnp.max(scores, axis=-1, keepdims=True)
    p = jnp.exp(scores)
    p = p * pl.reciprocal(jnp.sum(p, axis=-1, keepdims=True), approx=False)

    # p @ v in f32; pad lanes of v are zero so pad lanes of the output are zero.
    out = jnp.dot(p, v, preferred_element_type=jnp.float32)   # (BT, pad)
    o_ref[...] = out.astype(o_ref.dtype)                      # full-lane unmasked store


def fuse_qkv_weights(wk, wq, wv, embed_size):
    """One-time (init-time) weight prep.

    wk/wq/wv: (H, head_size) f32, already transposed from the PyTorch
    (out, in) layout.  Returns (H, 3*128) bf16 with each projection
    zero-padded into its own lane-aligned 128-lane slot and the embed**-0.5
    attention scale folded into the Q slot (scale applied in f32, then cast).

    NOTE: correctness of the kernel depends on the pad lanes being exactly
    zero (scores and p@v contract over the full 128-lane slots).
    """
    H, hs = wk.shape
    scale = float(embed_size) ** -0.5     # PyTorch code scales by H (embed), not head_size
    w = jnp.zeros((H, 3 * _LANE), jnp.float32)
    w = w.at[:, 0 * _LANE:0 * _LANE + hs].set(wk.astype(jnp.float32))
    w = w.at[:, 1 * _LANE:1 * _LANE + hs].set(wq.astype(jnp.float32) * scale)
    w = w.at[:, 2 * _LANE:2 * _LANE + hs].set(wv.astype(jnp.float32))
    return w.astype(jnp.bfloat16)


def _build_mask(bt_pad, T):
    """Additive block-diagonal causal mask over the row-padded (BT_pad, BT_pad)
    score tile, precomputed host-side (B, T are static)."""
    r = np.arange(bt_pad)[:, None]
    c = np.arange(bt_pad)[None, :]
    allowed = ((r // T) == (c // T)) & ((r % T) >= (c % T))
    # Large finite negative (not -inf): robust even for padded rows, and it
    # still underflows to exactly 0 after exp.
    return jnp.asarray(np.where(allowed, 0.0, -1e30), dtype=jnp.float32)


def head_forward(x, w_fused, head_size):
    """x: (B, T, H) f32; w_fused: (H, 3*128) bf16 from fuse_qkv_weights."""
    B, T, H = x.shape
    hs = head_size
    bt = B * T
    bt_pad = max(_SUBLANE, ((bt + _SUBLANE - 1) // _SUBLANE) * _SUBLANE)

    # Flatten batch*time and zero-pad rows up to a full sublane group; cast the
    # MXU operand to bf16 at the boundary (accumulation stays f32 in-kernel).
    x_flat = jnp.zeros((bt_pad, H), jnp.bfloat16)
    x_flat = x_flat.at[:bt].set(x.reshape(bt, H).astype(jnp.bfloat16))

    mask = _build_mask(bt_pad, T)

    out = pl.pallas_call(
        functools.partial(_head_kernel, pad=_LANE),
        out_shape=jax.ShapeDtypeStruct((bt_pad, _LANE), jnp.float32),
        grid=(1,),   # single invocation: whole (padded) batch fits in one tile
        in_specs=[
            pl.BlockSpec((bt_pad, H), lambda i: (0, 0)),
            pl.BlockSpec((H, 3 * _LANE), lambda i: (0, 0)),
            pl.BlockSpec((bt_pad, bt_pad), lambda i: (0, 0)),
        ],
        out_specs=pl.BlockSpec((bt_pad, _LANE), lambda i: (0, 0)),
        compiler_params=pltpu.CompilerParams(
            # 1-step grid: no megacore sharding until multi-head fusion gives
            # this kernel >=2 independent grid steps (then mark "parallel").
            dimension_semantics=("arbitrary",),
        ),
    )(x_flat, w_fused, mask)

    # Wrapper-side slice of the lane/sublane-dense slab (free layout plumbing).
    return out[:bt, :hs].reshape(B, T, hs)


def _reference_f32(x, wk, wq, wv):
    """Pure-JAX f32 replica of the PyTorch forward (the spec)."""
    B, T, H = x.shape
    k = x @ wk
    q = x @ wq
    v = x @ wv
    w = (q @ jnp.swapaxes(k, -2, -1)) * (H ** -0.5)
    tril = jnp.tril(jnp.ones((T, T)))
    w = jnp.where(tril == 0, -jnp.inf, w)
    w = jax.nn.softmax(w, axis=-1)
    return w @ v


def _reference_bf16_operands(x, wk, wq, wv):
    """Same math in f32, but with the MXU operands quantized to bf16 exactly
    as the kernel sees them (isolates kernel-math correctness from the
    intentional bf16 operand cast)."""
    B, T, H = x.shape
    scale = H ** -0.5
    xb = x.astype(jnp.bfloat16).astype(jnp.float32)
    wkb = wk.astype(jnp.bfloat16).astype(jnp.float32)
    wqb = (wq * scale).astype(jnp.bfloat16).astype(jnp.float32)
    wvb = wv.astype(jnp.bfloat16).astype(jnp.float32)
    k = xb @ wkb
    q = xb @ wqb
    v = xb @ wvb
    w = q @ jnp.swapaxes(k, -2, -1)          # scale already folded into wqb
    tril = jnp.tril(jnp.ones((T, T)))
    w = jnp.where(tril == 0, -jnp.inf, w)
    w = jax.nn.softmax(w, axis=-1)
    return w @ v


if __name__ == "__main__":
    key = jax.random.PRNGKey(0)
    kx, kk, kq, kv = jax.random.split(key, 4)

    B, T, H, hs = 2, BLOCK_SIZE, N_EMBED, HEAD_SIZE

    x = jax.random.normal(kx, (B, T, H), dtype=jnp.float32)

    # Deterministic nn.Linear-like init (uniform(-1/sqrt(fan_in), 1/sqrt(fan_in))),
    # stored pre-transposed as (embed, head_size).
    bound = 1.0 / (H ** 0.5)
    wk = jax.random.uniform(kk, (H, hs), jnp.float32, -bound, bound)
    wq = jax.random.uniform(kq, (H, hs), jnp.float32, -bound, bound)
    wv = jax.random.uniform(kv, (H, hs), jnp.float32, -bound, bound)

    # One-time weight fusion (init-time in a real model).
    w_fused = fuse_qkv_weights(wk, wq, wv, H)

    out = head_forward(x, w_fused, hs)
    out = jax.block_until_ready(out)
    assert out.shape == (B, T, hs)

    # Tight check against the same computation with bf16-quantized operands
    # (verifies the kernel math itself).
    ref_q = _reference_bf16_operands(x, wk, wq, wv)
    assert jnp.allclose(out, ref_q, atol=5e-3, rtol=5e-3), "mismatch vs bf16-operand reference"

    # Looser check against the full-f32 PyTorch-faithful reference; the gap is
    # solely the intentional bf16 cast of the MXU operands.
    ref = _reference_f32(x, wk, wq, wv)
    assert jnp.allclose(out, ref, atol=3e-2, rtol=3e-2), "mismatch vs f32 reference"

    print("KERNEL_OK")
</pallas_src>

<mosaic_0001>
module attributes {stable_mosaic.version = 11 : i64} {
  func.func @_head_kernel(%arg0: i32, %arg1: memref<8x132xbf16, #tpu.memory_space<vmem>>, %arg2: memref<132x384xbf16, #tpu.memory_space<vmem>>, %arg3: memref<8x8xf32, #tpu.memory_space<vmem>>, %arg4: memref<8x128xf32, #tpu.memory_space<vmem>>) attributes {dimension_semantics = [#tpu.dimension_semantics<arbitrary>], iteration_bounds = array<i64: 1>, scalar_prefetch = 0 : i64, scratch_operands = 0 : i64, tpu.core_type = #tpu.core_type<tc>, window_params = [{pipeline_mode = #tpu.pipeline_mode<synchronous>, transform_indices = @transform_0, window_bounds = array<i64: 8, 132>}, {pipeline_mode = #tpu.pipeline_mode<synchronous>, transform_indices = @transform_1, window_bounds = array<i64: 132, 384>}, {pipeline_mode = #tpu.pipeline_mode<synchronous>, transform_indices = @transform_2, window_bounds = array<i64: 8, 8>}, {pipeline_mode = #tpu.pipeline_mode<synchronous>, transform_indices = @transform_3, window_bounds = array<i64: 8, 128>}]} {
    %c0 = arith.constant 0 : index
    %c0_0 = arith.constant 0 : index
    %0 = vector.load %arg1[%c0, %c0_0] : memref<8x132xbf16, #tpu.memory_space<vmem>>, vector<8x132xbf16>
    %c0_1 = arith.constant 0 : index
    %c0_2 = arith.constant 0 : index
    %1 = vector.load %arg2[%c0_1, %c0_2] : memref<132x384xbf16, #tpu.memory_space<vmem>>, vector<132x384xbf16>
    %cst = arith.constant dense<0.000000e+00> : vector<8x384xf32>
    %2 = tpu.matmul %0, %1, %cst {dimension_numbers = #tpu.dot_dimension_numbers<[1], [0], [0], [1], [0, 0, 1, 1], [], []>} : vector<8x132xbf16>, vector<132x384xbf16>, vector<8x384xf32> -> vector<8x384xf32>
    %3 = vector.extract_strided_slice %2 {offsets = [0, 0], sizes = [8, 128], strides = [1, 1]} : vector<8x384xf32> to vector<8x128xf32>
    %4 = vector.extract_strided_slice %2 {offsets = [0, 128], sizes = [8, 128], strides = [1, 1]} : vector<8x384xf32> to vector<8x128xf32>
    %5 = vector.extract_strided_slice %2 {offsets = [0, 256], sizes = [8, 128], strides = [1, 1]} : vector<8x384xf32> to vector<8x128xf32>
    %cst_3 = arith.constant dense<0.000000e+00> : vector<8x8xf32>
    %6 = tpu.matmul %4, %3, %cst_3 {dimension_numbers = #tpu.dot_dimension_numbers<[1], [1], [0], [0], [0, 0, 1, 0], [], []>} : vector<8x128xf32>, vector<8x128xf32>, vector<8x8xf32> -> vector<8x8xf32>
    %c0_4 = arith.constant 0 : index
    %c0_5 = arith.constant 0 : index
    %7 = vector.load %arg3[%c0_4, %c0_5] : memref<8x8xf32, #tpu.memory_space<vmem>>, vector<8x8xf32>
    %8 = arith.addf %6, %7 : vector<8x8xf32>
    %cst_6 = arith.constant dense<0xFF800000> : vector<8xf32>
    %9 = vector.multi_reduction <maximumf>, %8, %cst_6 [1] : vector<8x8xf32> to vector<8xf32>
    %10 = vector.shape_cast %9 : vector<8xf32> to vector<8x1xf32>
    %11 = vector.broadcast %10 : vector<8x1xf32> to vector<8x8xf32>
    %12 = arith.subf %8, %11 : vector<8x8xf32>
    %13 = math.exp %12 : vector<8x8xf32>
    %cst_7 = arith.constant dense<0.000000e+00> : vector<8xf32>
    %14 = vector.multi_reduction <add>, %13, %cst_7 [1] : vector<8x8xf32> to vector<8xf32>
    %15 = vector.shape_cast %14 : vector<8xf32> to vector<8x1xf32>
    %16 = tpu.reciprocal %15 : vector<8x1xf32> -> vector<8x1xf32>
    %17 = vector.broadcast %16 : vector<8x1xf32> to vector<8x8xf32>
    %18 = arith.mulf %13, %17 : vector<8x8xf32>
    %cst_8 = arith.constant dense<0.000000e+00> : vector<8x128xf32>
    %19 = tpu.matmul %18, %5, %cst_8 {dimension_numbers = #tpu.dot_dimension_numbers<[1], [0], [0], [1], [0, 0, 1, 1], [], []>} : vector<8x8xf32>, vector<8x128xf32>, vector<8x128xf32> -> vector<8x128xf32>
    %c0_9 = arith.constant 0 : index
    %c0_10 = arith.constant 0 : index
    %20 = vector.load %arg4[%c0_9, %c0_10] : memref<8x128xf32, #tpu.memory_space<vmem>>, vector<8x128xf32>
    tpu.vector_store %arg4[%c0_9, %c0_10], %19 {strides = array<i32>} : memref<8x128xf32, #tpu.memory_space<vmem>>, vector<8x128xf32>,
    return
  }
  func.func @transform_0(%arg0: i32) -> (i32, i32) {
    %c0_i32 = arith.constant 0 : i32
    %c0_i32_0 = arith.constant 0 : i32
    %c0_i32_1 = arith.constant 0 : i32
    return %c0_i32, %c0_i32_0 : i32, i32
  }
  func.func @transform_1(%arg0: i32) -> (i32, i32) {
    %c0_i32 = arith.constant 0 : i32
    %c0_i32_0 = arith.constant 0 : i32
    %c0_i32_1 = arith.constant 0 : i32
    return %c0_i32, %c0_i32_0 : i32, i32
  }
  func.func @transform_2(%arg0: i32) -> (i32, i32) {
    %c0_i32 = arith.constant 0 : i32
    %c0_i32_0 = arith.constant 0 : i32
    %c0_i32_1 = arith.constant 0 : i32
    return %c0_i32, %c0_i32_0 : i32, i32
  }
  func.func @transform_3(%arg0: i32) -> (i32, i32) {
    %c0_i32 = arith.constant 0 : i32
    %c0_i32_0 = arith.constant 0 : i32
    %c0_i32_1 = arith.constant 0 : i32
    return %c0_i32, %c0_i32_0 : i32, i32
  }
}

</mosaic_0001>

<bundles_post_ra>
// kernel: tpu_custom_call.1
= control target key start
LH: loop header
LB: loop body
LE: loop exit
PB: predicated region body
PF: predicated region fallthrough
CT: control target
= control target key end

     0   :  { %8 = vsyncpa [#allocation3], 0  ;;  %s774_s0 = inlined_call_operand.hbm [shape: bf16[8,132], index: 0, kind: input, shape index: {}]   ;;  %s775_s1 = inlined_call_operand.hbm [shape: bf16[132,384], index: 1, kind: input, shape index: {}]   ;;  %s776_s2 = inlined_call_operand.hbm [shape: f32[8,8], index: 2, kind: input, shape index: {}]   ;;  %s777_s3 = inlined_call_operand.hbm [shape: f32[8,128], index: 3, kind: output, shape index: {}]  }
   0x1   :  { %9 = vsyncpa [#allocation6], 0 }
   0x2   :  { %10 = vsyncpa [#allocation4], 0  ;;  %s689_s12 = smov [#allocation5]   ;;  %s595_s16 = scalar_lea.hbm %s775_s1, 3264 }
   0x3   :  { %s26_s13 = sshll.u32 %s689_s12, 4  ;;  %p596_p0 = scmp.ne.s32.totalorder %s775_s1, %s595_s16  ;;  %s27_s13 = int_to_ptr.vmem [resolvable:$true] %s26_s13 }
   0x4   :  { %p599_p1 = scmp.lt.u32.totalorder %s595_s16, %s775_s1 }
   0x6   :  { %p601_p2 = pnand %p599_p1, %p596_p0 }
   0x8   :  { %604 = shalt.err (!%p601_p2)
}
   0x9   :  { %s605_s21 = scalar_lea.vmem %s27_s13, 3264  ;;  %p610_p4 = scmp.lt.s32.totalorder %s27_s13, %s27_s13 }
   0xa   :  { %p606_p3 = scmp.ne.s32.totalorder %s27_s13, %s605_s21  ;;  %p611_p5 = scmp.lt.s32.totalorder %s605_s21, %s605_s21 }
   0xc   :  { %p612_p6 = por %p611_p5, %p610_p4 }
   0xe   :  { %p613_p7 = pnand %p612_p6, %p606_p3 }
  0x10   :  { %616 = shalt.err (!%p613_p7)
}
  0x11   :  { %s690_s22 = smov 192   ;;  %s691_s23 = smov 12  }
  0x12   :  { %32 = dma.hbm_to_vmem [thread:$0]  %s775_s1, 3264, %s27_s13, [#allocation6], %s690_s22, %s690_s22, %s691_s23  }
  0x13   :  { %s692_s26 = smov [#allocation2]   ;;  %s693_s28 = smov [#allocation7]  }
  0x14   :  { %s17_s27 = sshll.u32 %s692_s26, 4  ;;  %s39_s29 = sshll.u32 %s693_s28, 4  ;;  %s18_s27 = int_to_ptr.vmem [resolvable:$true] %s17_s27  ;;  %s40_s29 = int_to_ptr.vmem [resolvable:$true] %s39_s29 }
  0x15   :  { %s617_s5 = scalar_lea.hbm %s774_s0, 128 }
  0x16   :  { %p618_p8 = scmp.ne.s32.totalorder %s774_s0, %s617_s5  ;;  %p621_p9 = scmp.lt.u32.totalorder %s617_s5, %s774_s0 }
  0x18   :  { %p623_p10 = pnand %p621_p9, %p618_p8 }
  0x1a   :  { %626 = shalt.err (!%p623_p10)
}
  0x1b   :  { %s627_s1 = scalar_lea.vmem %s18_s27, 128  ;;  %p632_p12 = scmp.lt.s32.totalorder %s18_s27, %s18_s27 }
  0x1c   :  { %p628_p11 = scmp.ne.s32.totalorder %s18_s27, %s627_s1  ;;  %p633_p13 = scmp.lt.s32.totalorder %s627_s1, %s627_s1 }
  0x1e   :  { %p634_p0 = por %p633_p13, %p632_p12 }
  0x20   :  { %p635_p1 = pnand %p634_p0, %p628_p11 }
  0x22   :  { %638 = shalt.err (!%p635_p1)
}
  0x23   :  { %20 = dma.hbm_to_vmem [thread:$0]  %s774_s0, 128, %s18_s27, [#allocation3]  }
  0x24   :  { %s639_s14 = scalar_lea.hbm %s776_s2, 128 }
  0x25   :  { %p640_p2 = scmp.ne.s32.totalorder %s776_s2, %s639_s14  ;;  %p643_p3 = scmp.lt.u32.totalorder %s639_s14, %s776_s2 }
  0x27   :  { %p645_p4 = pnand %p643_p3, %p640_p2 }
  0x29   :  { %648 = shalt.err (!%p645_p4)
}
  0x2a   :  { %s649_s19 = scalar_lea.vmem %s40_s29, 128  ;;  %p654_p6 = scmp.lt.s32.totalorder %s40_s29, %s40_s29 }
  0x2b   :  { %p650_p5 = scmp.ne.s32.totalorder %s40_s29, %s649_s19  ;;  %p655_p7 = scmp.lt.s32.totalorder %s649_s19, %s649_s19 }
  0x2d   :  { %p656_p8 = por %p655_p7, %p654_p6 }
  0x2f   :  { %p657_p9 = pnand %p656_p8, %p650_p5 }
  0x31   :  { %660 = shalt.err (!%p657_p9)
}
  0x32   :  { %42 = dma.hbm_to_vmem [thread:$0]  %s776_s2, 128, %s40_s29, [#allocation6]  }
  0x33   :  { %683 = dma.done.wait [#allocation3], 128  }
  0x34   :  { %684 = vsyncadd [#allocation3], 4294967168 }
  0x35   :  { %685 = dma.done.wait [#allocation6], 3392  }
  0x36   :  { %686 = vsyncadd [#allocation6], 4294963904  ;;  %v554_v0 = vld [vmem:[#allocation5 + $0x4] ss:$12 sps:$4 sm:$0xff]   ;;  %v556_v1 = vld [vmem:[#allocation5] ss:$12 sps:$4 sm:$0xff]  }
  0x37   :  { %244 = vmatprep.subr.bf16.mxu0 %v554_v0  ;;  %v557_v2 = vld [vmem:[#allocation5 + $0x1c] ss:$12 sps:$4 sm:$0xff]   ;;  %v559_v3 = vld [vmem:[#allocation5 + $0x18] ss:$12 sps:$4 sm:$0xff]   ;;  %v560_v4 = vld [vmem:[#allocation5 + $0x34] ss:$12 sps:$4 sm:$0xff]  }
  0x38   :  { %245 = vmatpush1.bf16.msra.mxu0 %v556_v1  ;;  %v562_v5 = vld [vmem:[#allocation5 + $0x30] ss:$12 sps:$4 sm:$0xff]   ;;  %v563_v6 = vld [vmem:[#allocation5 + $0x4c] ss:$12 sps:$4 sm:$0xff]   ;;  %v565_v7 = vld [vmem:[#allocation5 + $0x48] ss:$12 sps:$4 sm:$0xff]  }
  0x39   :  { %246 = vmatprep.subr.bf16.mxu0 %v557_v2  ;;  %v566_v8 = vld [vmem:[#allocation5 + $0x64] ss:$12 sps:$4 sm:$0xff]   ;;  %v53_v9 = vld [vmem:[#allocation2] sm:$0xff]  ;;  %vm230_vm0 = vcmask 31744   ;;  %v568_v11 = vld [vmem:[#allocation5 + $0x60] ss:$12 sps:$4 sm:$0xff]  }
  0x3a   :  { %v499_v10 = vcombine.high %v53_v9, %v53_v9  ;;  %v569_v12 = vld [vmem:[#allocation5 + $0x7c] ss:$12 sps:$4 sm:$0xff]   ;;  %v571_v13 = vld [vmem:[#allocation5 + $0x78] ss:$12 sps:$4 sm:$0xff]   ;;  %v572_v14 = vld [vmem:[#allocation5 + $0x94] ss:$12 sps:$4 sm:$0xff]   ;;  %v498_v22 = vcombine.low %v53_v9, %v53_v9 }
  0x3b   :  { %v574_v15 = vld [vmem:[#allocation5 + $0x90] ss:$12 sps:$4 sm:$0xff]   ;;  %v575_v16 = vld [vmem:[#allocation5 + $0xac] ss:$12 sps:$4 sm:$0xff]   ;;  %v86_v17 = vld [vmem:[#allocation5 + $0xc0] sm:$0x33] }
  0x3c   :  { %247 = vmatpush1.bf16.msra.mxu0 %v559_v3  ;;  %528 = vmatprep.mubr.msk.bf16.mxu0 %vm230_vm0, %v499_v10  ;;  %v577_v18 = vld [vmem:[#allocation5 + $0xa8] ss:$12 sps:$4 sm:$0xff]   ;;  %v525_v19 = vcombine.high %v86_v17, %v86_v17  ;;  %v524_v20 = vcombine.low %v86_v17, %v86_v17  ;;  %vm234_vm1 = vcmask 1041408   ;;  %v694_v23 = vmov 0.0   ;;  %v583_v30 = vld [vmem:[#allocation5 + $0x20] ss:$12 sps:$4 sm:$0xff]  }
  0x3d   :  { %248 = vmatprep.subr.bf16.mxu0 %v560_v4  ;;  %529 = vmatprep.mubr.msk.bf16.mxu1 %vm230_vm0, %v499_v10  ;;  %vm695_vm2 = vmmov 0   ;;  %v582_v28 = vld [vmem:[#allocation5 + $0x8] ss:$12 sps:$4 sm:$0xff]   ;;  %v696_v29 = vmov 0   ;;  %v584_v31 = vld [vmem:[#allocation5 + $0x38] ss:$12 sps:$4 sm:$0xff]  }
  0x3e   :  { %v236_v21 = vsel %vm234_vm1, %v524_v20, 0  ;;  %285 = vmatprep.subr.bf16.mxu1 %v696_v29  ;;  %v585_v32 = vld [vmem:[#allocation5 + $0x50] ss:$12 sps:$4 sm:$0xff]   ;;  %v586_v33 = vld [vmem:[#allocation5 + $0x68] ss:$12 sps:$4 sm:$0xff]   ;;  %vm396_vm3 = vcmask 64512  }
  0x3f   :  { %286 = vmatpush1.bf16.msra.mxu1 %v582_v28  ;;  %v587_v34 = vld [vmem:[#allocation5 + $0x80] ss:$12 sps:$4 sm:$0xff]   ;;  %v588_v35 = vld [vmem:[#allocation5 + $0x98] ss:$12 sps:$4 sm:$0xff]   ;;  %v589_v36 = vld [vmem:[#allocation5 + $0xb0] ss:$12 sps:$4 sm:$0xff]  }
  0x40   :  { %249 = vmatpush1.bf16.msra.mxu0 %v562_v5  ;;  %287 = vmatprep.subr.bf16.mxu1 %v696_v29  ;;  %v590_v37 = vld [vmem:[#allocation5 + $0xc8] ss:$0 sps:$4 sm:$0x33]   ;;  %v325_v39 = vld [vmem:[#allocation7] sm:$0xff]  ;;  %s697_s2 = smov [#allocation8]  }
  0x41   :  { %250 = vmatprep.subr.bf16.mxu0 %v563_v6  ;;  %v242_v38 = vsel %vm234_vm1, %v590_v37, 0  ;;  %s488_s21 = sshll.u32 %s697_s2, 4  ;;  %s489_s21 = int_to_ptr.vmem [resolvable:$true] %s488_s21 }
  0x42   :  { %s661_s22 = scalar_lea.vmem %s489_s21, 128  ;;  %p666_p11 = scmp.lt.s32.totalorder %s489_s21, %s489_s21 }
  0x43   :  { %288 = vmatpush1.bf16.msra.mxu1 %v583_v30  ;;  %p662_p10 = scmp.ne.s32.totalorder %s489_s21, %s661_s22  ;;  %p667_p12 = scmp.lt.s32.totalorder %s661_s22, %s661_s22 }
  0x44   :  { %251 = vmatpush1.bf16.msra.mxu0 %v565_v7  ;;  %289 = vmatprep.subr.bf16.mxu1 %v696_v29 }
  0x45   :  { %252 = vmatprep.subr.bf16.mxu0 %v566_v8  ;;  %p668_p13 = por %p667_p12, %p666_p11 }
  0x47   :  { %290 = vmatpush1.bf16.msra.mxu1 %v584_v31  ;;  %p669_p0 = pnand %p668_p13, %p662_p10 }
  0x48   :  { %253 = vmatpush1.bf16.msra.mxu0 %v568_v11  ;;  %291 = vmatprep.subr.bf16.mxu1 %v696_v29 }
  0x49   :  { %254 = vmatprep.subr.bf16.mxu0 %v569_v12 }
  0x4b   :  { %292 = vmatpush1.bf16.msra.mxu1 %v585_v32 }
  0x4c   :  { %255 = vmatpush1.bf16.msra.mxu0 %v571_v13  ;;  %293 = vmatprep.subr.bf16.mxu1 %v696_v29 }
  0x4d   :  { %256 = vmatprep.subr.bf16.mxu0 %v572_v14 }
  0x4f   :  { %294 = vmatpush1.bf16.msra.mxu1 %v586_v33 }
  0x50   :  { %257 = vmatpush1.bf16.msra.mxu0 %v574_v15  ;;  %295 = vmatprep.subr.bf16.mxu1 %v696_v29 }
  0x51   :  { %258 = vmatprep.subr.bf16.mxu0 %v575_v16 }
  0x53   :  { %296 = vmatpush1.bf16.msra.mxu1 %v587_v34 }
  0x54   :  { %259 = vmatpush1.bf16.msra.mxu0 %v577_v18  ;;  %297 = vmatprep.subr.bf16.mxu1 %v696_v29 }
  0x55   :  { %527 = vmatprep.subr.msk.bf16.mxu0 %vm234_vm1, %v525_v19 }
  0x57   :  { %298 = vmatpush1.bf16.msra.mxu1 %v588_v35 }
  0x58   :  { %261 = vmatpush1.bf16.msra.mxu0 %v236_v21  ;;  %299 = vmatprep.subr.bf16.mxu1 %v696_v29 }
  0x59   :  { %535 = vmatprep.subr.mxu0 %v694_v23 }
  0x5b   :  { %277 = vmatmul.mubr.bf16.vlgmr.msra.gmra.mrb[0].mxu0 %v498_v22  ;;  %300 = vmatpush1.bf16.msra.mxu1 %v589_v36 }
  0x5c   :  { %537 = vmatprep.mubr.msk.f32.mxu0 %vm695_vm2, %v694_v23  ;;  %301 = vmatprep.subr.bf16.mxu1 %v696_v29 }
  0x5f   :  { %302 = vmatpush1.bf16.msra.mxu1 %v242_v38 }
  0x60   :  { %540 = vmatprep.subr.mxu1 %v694_v23 }
  0x62   :  { %318 = vmatmul.mubr.bf16.vlgmr.msra.gmra.mrb[0].mxu1 %v498_v22 }
  0x63   :  { %542 = vmatprep.mubr.msk.f32.mxu1 %vm695_vm2, %v694_v23 }
 0x12e   :  { %v278_v24 = vpop.f32.mrb[0].mxu0 }
 0x12f   :  { %v280_v25 = vpop.f32.mrb[1].mxu0  ;;  %536 = vmatpush3.xpose.msra.mxu0 %v278_v24 }
 0x130   :  { %v282_v26 = vpop.f32.mrb[2].mxu0 }
 0x131   :  { %v283_v27 = vpop.f32.mrb[3].mxu0 }
 0x132   :  { %538 = vmatmul.mubr.f32.vlgmr.msra.gmra.mrb[4].mxu0 %v280_v25 }
 0x135   :  { %v319_v49 = vpop.f32.mrb[0].mxu1 }
 0x136   :  { %v321_v50 = vpop.f32.mrb[1].mxu1  ;;  %541 = vmatpush3.msra.mxu1 %v319_v49 }
 0x137   :  { %v322_v51 = vpop.f32.mrb[2].mxu1 }
 0x138   :  { %v323_v52 = vpop.f32.mrb[3].mxu1 }
 0x205   :  { %v392_v40 = vpop.f32.mrb[4].mxu0 }
 0x206   :  { %v393_v41 = vadd.f32 %v392_v40, %v325_v39  ;;  %v539_v42 = vpop.f32.mrb[5].mxu0 }
 0x208   :  { %v397_v43 = vsel %vm396_vm3, %v393_v41, -inf }
 0x209   :  { %398 = vmax.xlane.f32.xlu0 %v397_v43 }
 0x296   :  { %v399_v44 = vpop.xlane.xlu0 %398 }
 0x297   :  { %v400_v45 = vsub.f32 %v393_v41, %v399_v44 }
 0x299   :  { %v401_v46 = vmul.f32 1.442695, %v400_v45 }
 0x29b   :  { %591 = vpow2.f32 %v401_v46 }
 0x2a5   :  { %v592_v47 = vpop.eup %591 }
 0x2a6   :  { %v403_v48 = vsel %vm396_vm3, %v592_v47, 0.0 }
 0x2a7   :  { %404 = vadd.xlane.f32.xlu0 %v403_v48 }
 0x334   :  { %v405_v53 = vpop.xlane.xlu0 %404 }
 0x335   :  { %593 = vrcp.f32 %v405_v53 }
 0x33f   :  { %v594_v54 = vpop.eup %593 }
 0x340   :  { %v407_v55 = vmul.f32 %v594_v54, %v592_v47 }
 0x342   :  { %543 = vmatmul.mubr.msk.f32.vlgmr.msra.gmra.mrb[4].mxu1 %vm396_vm3, %v407_v55 }
 0x415   :  { %v477_v56 = vpop.f32.mrb[4].mxu1 }
 0x416   :  { %481 = vst [vmem:[#allocation8] sm:$0xff] %v477_v56  ;;  %v544_v57 = vpop.f32.mrb[5].mxu1 }
 0x417   :  { %672 = shalt.err (!%p669_p0)
}
 0x418   :  { %s673_s25 = scalar_lea.hbm %s777_s3, 128 }
 0x419   :  { %p674_p1 = scmp.ne.s32.totalorder %s777_s3, %s673_s25  ;;  %p677_p2 = scmp.lt.u32.totalorder %s673_s25, %s777_s3 }
 0x41b   :  { %p679_p3 = pnand %p677_p2, %p674_p1 }
 0x41d   :  { %682 = shalt.err (!%p679_p3)
}
 0x41e   :  { %491 = dma.vmem_to_hbm [thread:$0]  %s489_s21, 128, %s777_s3, [#allocation4]  }
 0x41f   :  { %687 = dma.done.wait [#allocation4], 128  }
 0x420   :  { %688 = vsyncadd [#allocation4], 4294967168 }
 0x421   :  { %495 = vsyncpa [#allocation3], 1 }
 0x422   :  { %496 = vsyncpa [#allocation6], 1 }
 0x423   :  { %497 = vsyncpa [#allocation4], 1 }

</bundles_post_ra>
